<compile_context>
chip_gen: v7x
topology: tpu7x:2x2x1
jax: 0.10.0
libtpu: 0.0.40
codegen_flags: <defaults>
</compile_context>

<pallas_src>
import jax
import jax.numpy as jnp
from jax.experimental import pallas as pl
from jax.experimental.pallas import tpu as pltpu

_BIG = 1.0e12  # matches the PyTorch 1000000000000.0 masking constant


def _round_up(x, m):
    return ((x + m - 1) // m) * m


def _ceil_div(a, b):
    return -(-a // b)


def _myloss_kernel(pred_ref, true_ref, out_ref, m_pos, s_pos, m_neg, s_neg):
    """One row block; online logsumexp over the tiled class axis (grid dim 1)."""
    k = pl.program_id(1)

    @pl.when(k == 0)
    def _():
        # Running logsumexp state over [x_seen, 0]:
        # m = 0, s = 1 accounts for the appended zero column.
        m_pos[...] = jnp.zeros_like(m_pos)
        s_pos[...] = jnp.ones_like(s_pos)
        m_neg[...] = jnp.zeros_like(m_neg)
        s_neg[...] = jnp.ones_like(s_neg)

    y_pred = pred_ref[...].astype(jnp.float32)
    is_pos = true_ref[...] != 0  # y_true assumed {0,1} (same as reference)

    # Select-based masking (no multiplies by the huge constant):
    #   y_flip      == (1 - 2*y_true) * y_pred
    #   x_pos/x_neg == y_flip with the "other" class pushed to -_BIG
    y_flip = jnp.where(is_pos, -y_pred, y_pred)
    x_pos = jnp.where(is_pos, y_flip, -_BIG)
    x_neg = jnp.where(is_pos, -_BIG, y_flip)

    # Online logsumexp update (positives).
    bm = jnp.max(x_pos, axis=-1, keepdims=True)
    m_new = jnp.maximum(m_pos[...], bm)
    s_pos[...] = (s_pos[...] * jnp.exp(m_pos[...] - m_new)
                  + jnp.sum(jnp.exp(x_pos - m_new), axis=-1, keepdims=True))
    m_pos[...] = m_new

    # Online logsumexp update (negatives).
    bm = jnp.max(x_neg, axis=-1, keepdims=True)
    m_new = jnp.maximum(m_neg[...], bm)
    s_neg[...] = (s_neg[...] * jnp.exp(m_neg[...] - m_new)
                  + jnp.sum(jnp.exp(x_neg - m_new), axis=-1, keepdims=True))
    m_neg[...] = m_new

    @pl.when(k == pl.num_programs(1) - 1)
    def _():
        pos_loss = jnp.log(s_pos[...]) + m_pos[...]
        neg_loss = jnp.log(s_neg[...]) + m_neg[...]
        out_ref[...] = pos_loss + neg_loss


def my_loss(y_pred, y_true, *, max_block_rows=256, max_block_n=4096):
    """Pallas equivalent of MyLoss.forward. Returns a scalar float32.

    y_pred / y_true: [B, C, S, S]; flattened to [B*C, S*S] (row-major, matches
    torch .view). Native dtypes are kept (the kernel up-casts per tile).
    """
    B, C, S1, S2 = y_pred.shape
    R = B * C
    N = S1 * S2

    yp = jnp.reshape(y_pred, (R, N))
    yt = jnp.reshape(y_true, (R, N))

    # Row tiling: multiple of 8 sublanes, up to max_block_rows.
    r8 = _round_up(R, 8)
    num_i = _ceil_div(r8, max_block_rows)
    block_r = _round_up(_ceil_div(r8, num_i), 8)
    r_pad = num_i * block_r

    # Class-axis tiling: multiple of 128 lanes, up to max_block_n.
    n128 = _round_up(N, 128)
    num_k = _ceil_div(n128, max_block_n)
    block_n = _round_up(_ceil_div(n128, num_k), 128)
    n_pad = num_k * block_n

    if (r_pad, n_pad) != (R, N):
        # Padded logits get -_BIG -> exp() underflows to 0 in both logsumexps,
        # so padded columns/rows contribute exactly 0 to the loss.
        yp = jnp.pad(yp, ((0, r_pad - R), (0, n_pad - N)),
                     constant_values=jnp.asarray(-_BIG, dtype=yp.dtype))
        yt = jnp.pad(yt, ((0, r_pad - R), (0, n_pad - N)))

    row_losses = pl.pallas_call(
        _myloss_kernel,
        out_shape=jax.ShapeDtypeStruct((r_pad, 1), jnp.float32),
        grid_spec=pltpu.PrefetchScalarGridSpec(
            num_scalar_prefetch=0,
            grid=(num_i, num_k),
            in_specs=[
                pl.BlockSpec((block_r, block_n), lambda i, k: (i, k)),
                pl.BlockSpec((block_r, block_n), lambda i, k: (i, k)),
            ],
            out_specs=pl.BlockSpec((block_r, 1), lambda i, k: (i, 0)),
            scratch_shapes=[pltpu.VMEM((block_r, 1), jnp.float32)] * 4,
        ),
        compiler_params=pltpu.CompilerParams(
            dimension_semantics=("parallel", "arbitrary"),
            vmem_limit_bytes=48 * 1024 * 1024,
        ),
    )(yp, yt)

    # Padded rows contribute exactly 0; mean over the real rows (pairwise
    # reduction in XLA, avoids serial f32 drift).
    return jnp.sum(row_losses) / jnp.float32(R)


def my_loss_ref(y_pred, y_true):
    """Pure-JAX reference mirroring the PyTorch forward, for validation."""
    B, C, S1, S2 = y_pred.shape
    yp = jnp.reshape(y_pred, (B * C, S1 * S2)).astype(jnp.float32)
    yt = jnp.reshape(y_true, (B * C, S1 * S2)).astype(jnp.float32)
    yp = (1.0 - 2.0 * yt) * yp
    ypp = yp - (1.0 - yt) * _BIG
    ypn = yp - yt * _BIG
    zeros = jnp.zeros_like(ypp[..., :1])
    ypp = jnp.concatenate([ypp, zeros], axis=-1)
    ypn = jnp.concatenate([ypn, zeros], axis=-1)
    pos = jax.scipy.special.logsumexp(ypp, axis=-1)
    neg = jax.scipy.special.logsumexp(ypn, axis=-1)
    return jnp.mean(pos + neg)


if __name__ == "__main__":
    key = jax.random.PRNGKey(0)

    def make_inputs(k, B, C, S, pred_dtype=jnp.float32, true_dtype=jnp.float32):
        k1, k2 = jax.random.split(k)
        yp = (jax.random.normal(k1, (B, C, S, S), dtype=jnp.float32)
              * 3.0).astype(pred_dtype)
        yt = jax.random.bernoulli(k2, p=0.15,
                                  shape=(B, C, S, S)).astype(true_dtype)
        return yp, yt

    cases = [
        # primary small case (batch=2, class_num=4, seq_len=8): N=64, R=8
        dict(B=2, C=4, S=8, pred_dtype=jnp.float32, true_dtype=jnp.float32,
             kw={}, rtol=1e-5),
        # lane padding exercised: N=1600 -> padded to 1664
        dict(B=2, C=4, S=40, pred_dtype=jnp.float32, true_dtype=jnp.float32,
             kw={}, rtol=1e-5),
        # multiple class-axis blocks (online logsumexp path): N=5184
        dict(B=2, C=4, S=72, pred_dtype=jnp.float32, true_dtype=jnp.float32,
             kw={}, rtol=1e-5),
        # multiple row blocks + row padding (R=15 -> 16), narrow input dtypes
        dict(B=3, C=5, S=16, pred_dtype=jnp.bfloat16, true_dtype=jnp.bool_,
             kw=dict(max_block_rows=8), rtol=1e-4),
    ]

    keys = jax.random.split(key, len(cases))
    for case, k in zip(cases, keys):
        yp, yt = make_inputs(k, case["B"], case["C"], case["S"],
                             case["pred_dtype"], case["true_dtype"])
        got = jax.block_until_ready(my_loss(yp, yt, **case["kw"]))
        want = jax.block_until_ready(my_loss_ref(yp, yt))
        assert jnp.allclose(got, want, rtol=case["rtol"], atol=1e-5), \
            (case["B"], case["C"], case["S"], got, want)

    print("KERNEL_OK")
</pallas_src>

<mosaic_0001>
module attributes {stable_mosaic.version = 11 : i64} {
  func.func @_myloss_kernel(%arg0: i32, %arg1: i32, %arg2: memref<8x128xf32, #tpu.memory_space<vmem>>, %arg3: memref<8x128xf32, #tpu.memory_space<vmem>>, %arg4: memref<8x1xf32, #tpu.memory_space<vmem>>, %arg5: memref<8x1xf32, #tpu.memory_space<vmem>>, %arg6: memref<8x1xf32, #tpu.memory_space<vmem>>, %arg7: memref<8x1xf32, #tpu.memory_space<vmem>>, %arg8: memref<8x1xf32, #tpu.memory_space<vmem>>) attributes {dimension_semantics = [#tpu.dimension_semantics<parallel>, #tpu.dimension_semantics<arbitrary>], iteration_bounds = array<i64: 1, 1>, scalar_prefetch = 0 : i64, scratch_operands = 4 : i64, tpu.core_type = #tpu.core_type<tc>, window_params = [{transform_indices = @transform_0, window_bounds = array<i64: 8, 128>}, {transform_indices = @transform_1, window_bounds = array<i64: 8, 128>}, {transform_indices = @transform_2, window_bounds = array<i64: 8, 1>}]} {
    %c0_i32 = arith.constant 0 : i32
    %0 = arith.cmpi eq, %arg1, %c0_i32 : i32
    %1 = arith.extui %0 : i1 to i32
    %c0_i32_0 = arith.constant 0 : i32
    %2 = arith.cmpi ne, %1, %c0_i32_0 : i32
    scf.if %2 {
      %cst_33 = arith.constant 0.000000e+00 : f32
      %51 = vector.broadcast %cst_33 : f32 to vector<8x1xf32>
      %c0_34 = arith.constant 0 : index
      %c0_35 = arith.constant 0 : index
      %52 = vector.load %arg5[%c0_34, %c0_35] : memref<8x1xf32, #tpu.memory_space<vmem>>, vector<8x1xf32>
      tpu.vector_store %arg5[%c0_34, %c0_35], %51 {strides = array<i32>} : memref<8x1xf32, #tpu.memory_space<vmem>>, vector<8x1xf32>,
      %cst_36 = arith.constant 1.000000e+00 : f32
      %53 = vector.broadcast %cst_36 : f32 to vector<8x1xf32>
      %c0_37 = arith.constant 0 : index
      %c0_38 = arith.constant 0 : index
      %54 = vector.load %arg6[%c0_37, %c0_38] : memref<8x1xf32, #tpu.memory_space<vmem>>, vector<8x1xf32>
      tpu.vector_store %arg6[%c0_37, %c0_38], %53 {strides = array<i32>} : memref<8x1xf32, #tpu.memory_space<vmem>>, vector<8x1xf32>,
      %cst_39 = arith.constant 0.000000e+00 : f32
      %55 = vector.broadcast %cst_39 : f32 to vector<8x1xf32>
      %c0_40 = arith.constant 0 : index
      %c0_41 = arith.constant 0 : index
      %56 = vector.load %arg7[%c0_40, %c0_41] : memref<8x1xf32, #tpu.memory_space<vmem>>, vector<8x1xf32>
      tpu.vector_store %arg7[%c0_40, %c0_41], %55 {strides = array<i32>} : memref<8x1xf32, #tpu.memory_space<vmem>>, vector<8x1xf32>,
      %cst_42 = arith.constant 1.000000e+00 : f32
      %57 = vector.broadcast %cst_42 : f32 to vector<8x1xf32>
      %c0_43 = arith.constant 0 : index
      %c0_44 = arith.constant 0 : index
      %58 = vector.load %arg8[%c0_43, %c0_44] : memref<8x1xf32, #tpu.memory_space<vmem>>, vector<8x1xf32>
      tpu.vector_store %arg8[%c0_43, %c0_44], %57 {strides = array<i32>} : memref<8x1xf32, #tpu.memory_space<vmem>>, vector<8x1xf32>,
    } else {
    }
    %c0 = arith.constant 0 : index
    %c0_1 = arith.constant 0 : index
    %3 = vector.load %arg2[%c0, %c0_1] : memref<8x128xf32, #tpu.memory_space<vmem>>, vector<8x128xf32>
    %c0_2 = arith.constant 0 : index
    %c0_3 = arith.constant 0 : index
    %4 = vector.load %arg3[%c0_2, %c0_3] : memref<8x128xf32, #tpu.memory_space<vmem>>, vector<8x128xf32>
    %cst = arith.constant 0.000000e+00 : f32
    %5 = vector.broadcast %cst : f32 to vector<8x128xf32>
    %6 = arith.cmpf one, %4, %5 : vector<8x128xf32>
    %cst_4 = arith.constant 0.000000e+00 : f32
    %7 = vector.broadcast %cst_4 : f32 to vector<8x128xf32>
    %8 = arith.subf %7, %3 : vector<8x128xf32>
    %9 = arith.select %6, %8, %3 : vector<8x128xi1>, vector<8x128xf32>
    %cst_5 = arith.constant -9.99999995E+11 : f32
    %10 = vector.broadcast %cst_5 : f32 to vector<8x128xf32>
    %11 = arith.select %6, %9, %10 : vector<8x128xi1>, vector<8x128xf32>
    %cst_6 = arith.constant -9.99999995E+11 : f32
    %12 = vector.broadcast %cst_6 : f32 to vector<8x128xf32>
    %13 = arith.select %6, %12, %9 : vector<8x128xi1>, vector<8x128xf32>
    %cst_7 = arith.constant dense<0xFF800000> : vector<8xf32>
    %14 = vector.multi_reduction <maximumf>, %11, %cst_7 [1] : vector<8x128xf32> to vector<8xf32>
    %15 = vector.shape_cast %14 : vector<8xf32> to vector<8x1xf32>
    %c0_8 = arith.constant 0 : index
    %c0_9 = arith.constant 0 : index
    %16 = vector.load %arg5[%c0_8, %c0_9] : memref<8x1xf32, #tpu.memory_space<vmem>>, vector<8x1xf32>
    %17 = arith.maximumf %16, %15 : vector<8x1xf32>
    %c0_10 = arith.constant 0 : index
    %c0_11 = arith.constant 0 : index
    %18 = vector.load %arg6[%c0_10, %c0_11] : memref<8x1xf32, #tpu.memory_space<vmem>>, vector<8x1xf32>
    %c0_12 = arith.constant 0 : index
    %c0_13 = arith.constant 0 : index
    %19 = vector.load %arg5[%c0_12, %c0_13] : memref<8x1xf32, #tpu.memory_space<vmem>>, vector<8x1xf32>
    %20 = arith.subf %19, %17 : vector<8x1xf32>
    %21 = math.exp %20 : vector<8x1xf32>
    %22 = arith.mulf %18, %21 : vector<8x1xf32>
    %23 = vector.broadcast %17 : vector<8x1xf32> to vector<8x128xf32>
    %24 = arith.subf %11, %23 : vector<8x128xf32>
    %25 = math.exp %24 : vector<8x128xf32>
    %cst_14 = arith.constant dense<0.000000e+00> : vector<8xf32>
    %26 = vector.multi_reduction <add>, %25, %cst_14 [1] : vector<8x128xf32> to vector<8xf32>
    %27 = vector.shape_cast %26 : vector<8xf32> to vector<8x1xf32>
    %28 = arith.addf %22, %27 : vector<8x1xf32>
    %c0_15 = arith.constant 0 : index
    %c0_16 = arith.constant 0 : index
    %29 = vector.load %arg6[%c0_15, %c0_16] : memref<8x1xf32, #tpu.memory_space<vmem>>, vector<8x1xf32>
    tpu.vector_store %arg6[%c0_15, %c0_16], %28 {strides = array<i32>} : memref<8x1xf32, #tpu.memory_space<vmem>>, vector<8x1xf32>,
    %c0_17 = arith.constant 0 : index
    %c0_18 = arith.constant 0 : index
    %30 = vector.load %arg5[%c0_17, %c0_18] : memref<8x1xf32, #tpu.memory_space<vmem>>, vector<8x1xf32>
    tpu.vector_store %arg5[%c0_17, %c0_18], %17 {strides = array<i32>} : memref<8x1xf32, #tpu.memory_space<vmem>>, vector<8x1xf32>,
    %cst_19 = arith.constant dense<0xFF800000> : vector<8xf32>
    %31 = vector.multi_reduction <maximumf>, %13, %cst_19 [1] : vector<8x128xf32> to vector<8xf32>
    %32 = vector.shape_cast %31 : vector<8xf32> to vector<8x1xf32>
    %c0_20 = arith.constant 0 : index
    %c0_21 = arith.constant 0 : index
    %33 = vector.load %arg7[%c0_20, %c0_21] : memref<8x1xf32, #tpu.memory_space<vmem>>, vector<8x1xf32>
    %34 = arith.maximumf %33, %32 : vector<8x1xf32>
    %c0_22 = arith.constant 0 : index
    %c0_23 = arith.constant 0 : index
    %35 = vector.load %arg8[%c0_22, %c0_23] : memref<8x1xf32, #tpu.memory_space<vmem>>, vector<8x1xf32>
    %c0_24 = arith.constant 0 : index
    %c0_25 = arith.constant 0 : index
    %36 = vector.load %arg7[%c0_24, %c0_25] : memref<8x1xf32, #tpu.memory_space<vmem>>, vector<8x1xf32>
    %37 = arith.subf %36, %34 : vector<8x1xf32>
    %38 = math.exp %37 : vector<8x1xf32>
    %39 = arith.mulf %35, %38 : vector<8x1xf32>
    %40 = vector.broadcast %34 : vector<8x1xf32> to vector<8x128xf32>
    %41 = arith.subf %13, %40 : vector<8x128xf32>
    %42 = math.exp %41 : vector<8x128xf32>
    %cst_26 = arith.constant dense<0.000000e+00> : vector<8xf32>
    %43 = vector.multi_reduction <add>, %42, %cst_26 [1] : vector<8x128xf32> to vector<8xf32>
    %44 = vector.shape_cast %43 : vector<8xf32> to vector<8x1xf32>
    %45 = arith.addf %39, %44 : vector<8x1xf32>
    %c0_27 = arith.constant 0 : index
    %c0_28 = arith.constant 0 : index
    %46 = vector.load %arg8[%c0_27, %c0_28] : memref<8x1xf32, #tpu.memory_space<vmem>>, vector<8x1xf32>
    tpu.vector_store %arg8[%c0_27, %c0_28], %45 {strides = array<i32>} : memref<8x1xf32, #tpu.memory_space<vmem>>, vector<8x1xf32>,
    %c0_29 = arith.constant 0 : index
    %c0_30 = arith.constant 0 : index
    %47 = vector.load %arg7[%c0_29, %c0_30] : memref<8x1xf32, #tpu.memory_space<vmem>>, vector<8x1xf32>
    tpu.vector_store %arg7[%c0_29, %c0_30], %34 {strides = array<i32>} : memref<8x1xf32, #tpu.memory_space<vmem>>, vector<8x1xf32>,
    %c0_i32_31 = arith.constant 0 : i32
    %48 = arith.cmpi eq, %arg1, %c0_i32_31 : i32
    %49 = arith.extui %48 : i1 to i32
    %c0_i32_32 = arith.constant 0 : i32
    %50 = arith.cmpi ne, %49, %c0_i32_32 : i32
    scf.if %50 {
      %c0_33 = arith.constant 0 : index
      %c0_34 = arith.constant 0 : index
      %51 = vector.load %arg6[%c0_33, %c0_34] : memref<8x1xf32, #tpu.memory_space<vmem>>, vector<8x1xf32>
      %52 = math.log %51 : vector<8x1xf32>
      %c0_35 = arith.constant 0 : index
      %c0_36 = arith.constant 0 : index
      %53 = vector.load %arg5[%c0_35, %c0_36] : memref<8x1xf32, #tpu.memory_space<vmem>>, vector<8x1xf32>
      %54 = arith.addf %52, %53 : vector<8x1xf32>
      %c0_37 = arith.constant 0 : index
      %c0_38 = arith.constant 0 : index
      %55 = vector.load %arg8[%c0_37, %c0_38] : memref<8x1xf32, #tpu.memory_space<vmem>>, vector<8x1xf32>
      %56 = math.log %55 : vector<8x1xf32>
      %c0_39 = arith.constant 0 : index
      %c0_40 = arith.constant 0 : index
      %57 = vector.load %arg7[%c0_39, %c0_40] : memref<8x1xf32, #tpu.memory_space<vmem>>, vector<8x1xf32>
      %58 = arith.addf %56, %57 : vector<8x1xf32>
      %59 = arith.addf %54, %58 : vector<8x1xf32>
      %c0_41 = arith.constant 0 : index
      %c0_42 = arith.constant 0 : index
      %60 = vector.load %arg4[%c0_41, %c0_42] : memref<8x1xf32, #tpu.memory_space<vmem>>, vector<8x1xf32>
      tpu.vector_store %arg4[%c0_41, %c0_42], %59 {strides = array<i32>} : memref<8x1xf32, #tpu.memory_space<vmem>>, vector<8x1xf32>,
    } else {
    }
    return
  }
  func.func @transform_0(%arg0: i32, %arg1: i32) -> (i32, i32) {
    %c0_i32 = arith.constant 0 : i32
    return %arg0, %arg1 : i32, i32
  }
  func.func @transform_1(%arg0: i32, %arg1: i32) -> (i32, i32) {
    %c0_i32 = arith.constant 0 : i32
    return %arg0, %arg1 : i32, i32
  }
  func.func @transform_2(%arg0: i32, %arg1: i32) -> (i32, i32) {
    %c0_i32 = arith.constant 0 : i32
    %c0_i32_0 = arith.constant 0 : i32
    return %arg0, %c0_i32 : i32, i32
  }
}

</mosaic_0001>

<bundles_post_ra>
// kernel: tpu_custom_call.1
= control target key start
LH: loop header
LB: loop body
LE: loop exit
PB: predicated region body
PF: predicated region fallthrough
CT: control target
= control target key end

     0   :  { %7 = vsyncpa [#allocation7], 0  ;;  %s239_s0 = inlined_call_operand.hbm [shape: f32[8,128], index: 0, kind: input, shape index: {}]   ;;  %s240_s1 = inlined_call_operand.hbm [shape: f32[8,128], index: 1, kind: input, shape index: {}]   ;;  %s241_s2 = inlined_call_operand.vmem [shape: f32[8,1], index: 2, kind: output, shape index: {}]  }
   0x1   :  { %8 = vsyncpa [#allocation9], 0  ;;  %s183_s9 = smov [#allocation6]   ;;  %s184_s11 = smov [#allocation8]  }
   0x2   :  { %s15_s10 = sshll.u32 %s183_s9, 4  ;;  %s25_s12 = sshll.u32 %s184_s11, 4  ;;  %s16_s10 = int_to_ptr.vmem [resolvable:$true] %s15_s10  ;;  %s26_s12 = int_to_ptr.vmem [resolvable:$true] %s25_s12 }
   0x3   :  { %s135_s15 = scalar_lea.hbm %s239_s0, 128 }
   0x4   :  { %p136_p0 = scmp.ne.s32.totalorder %s239_s0, %s135_s15  ;;  %p139_p1 = scmp.lt.u32.totalorder %s135_s15, %s239_s0 }
   0x6   :  { %p141_p2 = pnand %p139_p1, %p136_p0 }
   0x8   :  { %144 = shalt.err (!%p141_p2)
}
   0x9   :  { %s145_s20 = scalar_lea.vmem %s16_s10, 128  ;;  %p150_p4 = scmp.lt.s32.totalorder %s16_s10, %s16_s10 }
   0xa   :  { %p146_p3 = scmp.ne.s32.totalorder %s16_s10, %s145_s20  ;;  %p151_p5 = scmp.lt.s32.totalorder %s145_s20, %s145_s20 }
   0xc   :  { %p152_p6 = por %p151_p5, %p150_p4 }
   0xe   :  { %p153_p7 = pnand %p152_p6, %p146_p3 }
  0x10   :  { %156 = shalt.err (!%p153_p7)
}
  0x11   :  { %18 = dma.hbm_to_vmem [thread:$0]  %s239_s0, 128, %s16_s10, [#allocation7]  }
  0x12   :  { %s157_s25 = scalar_lea.hbm %s240_s1, 128 }
  0x13   :  { %p158_p8 = scmp.ne.s32.totalorder %s240_s1, %s157_s25  ;;  %p161_p9 = scmp.lt.u32.totalorder %s157_s25, %s240_s1 }
  0x15   :  { %p163_p10 = pnand %p161_p9, %p158_p8 }
  0x17   :  { %166 = shalt.err (!%p163_p10)
}
  0x18   :  { %s167_s30 = scalar_lea.vmem %s26_s12, 128  ;;  %p172_p12 = scmp.lt.s32.totalorder %s26_s12, %s26_s12 }
  0x19   :  { %p168_p11 = scmp.ne.s32.totalorder %s26_s12, %s167_s30  ;;  %p173_p13 = scmp.lt.s32.totalorder %s167_s30, %s167_s30 }
  0x1b   :  { %p174_p0 = por %p173_p13, %p172_p12 }
  0x1d   :  { %p175_p1 = pnand %p174_p0, %p168_p11 }
  0x1f   :  { %178 = shalt.err (!%p175_p1)
}
  0x20   :  { %28 = dma.hbm_to_vmem [thread:$0]  %s240_s1, 128, %s26_s12, [#allocation9]  }
  0x21   :  { %179 = dma.done.wait [#allocation7], 128  }
  0x22   :  { %180 = vsyncadd [#allocation7], 4294967168 }
  0x23   :  { %181 = dma.done.wait [#allocation9], 128  }
  0x24   :  { %182 = vsyncadd [#allocation9], 4294967168  ;;  %vm39_vm0 = vcmask 7168   ;;  %v185_v0 = vmov 0.0   ;;  %v44_v1 = vld [vmem:[#allocation6] sm:$0xff]  ;;  %v45_v2 = vld [vmem:[#allocation8] sm:$0xff] }
  0x25   :  { %40 = vst.msk [vmem:[#allocation2] sm:$0xff] %vm39_vm0, %v185_v0  ;;  %42 = vst.msk [vmem:[#allocation4] sm:$0xff] %vm39_vm0, %v185_v0  ;;  %vm46_vm1 = vcmp.ne.f32.partialorder %v45_v2, 0.0  ;;  %v47_v3 = vsub.f32 0.0, %v44_v1  ;;  %v186_v6 = vmov 0   ;;  %v187_v7 = vmov 1.0  }
  0x26   :  { %v49_v5 = vsel %vm46_vm1, -1e+12, %v44_v1  ;;  %121 = vset.pattern.permute.xlu1 %v186_v6  ;;  %122 = vset.pattern.permute.xlu0 %v186_v6  ;;  %41 = vst.msk [vmem:[#allocation3] sm:$0xff] %vm39_vm0, %v187_v7  ;;  %43 = vst.msk [vmem:[#allocation5] sm:$0xff] %vm39_vm0, %v187_v7 }
  0x27   :  { %v48_v4 = vsel %vm46_vm1, %v47_v3, -1e+12 }
  0x28   :  { %50 = vmax.xlane.f32.xlu0 %v48_v4 }
  0x2c   :  { %73 = vmax.xlane.f32.xlu0 %v49_v5  ;;  %v52_v8 = vld [vmem:[#allocation2] sm:$0xff]  ;;  %v75_v11 = vld [vmem:[#allocation4] sm:$0xff] }
  0x2d   :  { %v54_v27 = vld [vmem:[#allocation3] sm:$0xff]  ;;  %v77_v31 = vld [vmem:[#allocation5] sm:$0xff] }
  0xb5   :  { %v51_v9 = vpop.xlane.xlu0 %50 }
  0xb6   :  { %v53_v10 = vmax.f32 %v52_v8, %v51_v9 }
  0xb8   :  { %v55_v12 = vsub.f32 %v52_v8, %v53_v10  ;;  %72 = vst.msk [vmem:[#allocation2] sm:$0xff] %vm39_vm0, %v53_v10  ;;  %61 = vperm.xlu1 %121, %v53_v10  }
  0xb9   :  { %v74_v13 = vpop.xlane.xlu0 %73 }
  0xba   :  { %v76_v14 = vmax.f32 %v75_v11, %v74_v13  ;;  %v56_v24 = vmul.f32 1.442695, %v55_v12 }
  0xbc   :  { %v78_v15 = vsub.f32 %v75_v11, %v76_v14  ;;  %94 = vst.msk [vmem:[#allocation4] sm:$0xff] %vm39_vm0, %v76_v14  ;;  %84 = vperm.xlu1 %121, %v76_v14  }
  0xbe   :  { %v79_v25 = vmul.f32 1.442695, %v78_v15 }
  0xbf   :  { %v101_v42 = vld [vmem:[#allocation2] sm:$0xff] }
  0xc3   :  { %v106_v43 = vld [vmem:[#allocation4] sm:$0xff] }
 0x137   :  { %v62_v16 = vpop.permute.xlu1 %61 }
 0x138   :  { %v64_v17 = vsub.f32 %v48_v4, %v62_v16 }
 0x13a   :  { %v65_v18 = vmul.f32 1.442695, %v64_v17 }
 0x13b   :  { %v85_v19 = vpop.permute.xlu1 %84 }
 0x13c   :  { %123 = vpow2.f32 %v65_v18  ;;  %v87_v20 = vsub.f32 %v49_v5, %v85_v19 }
 0x13e   :  { %v88_v21 = vmul.f32 1.442695, %v87_v20 }
 0x140   :  { %125 = vpow2.f32 %v88_v21 }
 0x141   :  { %127 = vpow2.f32 %v56_v24 }
 0x142   :  { %129 = vpow2.f32 %v79_v25 }
 0x146   :  { %v124_v22 = vpop.eup %123 }
 0x147   :  { %67 = vadd.xlane.f32.xlu0 %v124_v22 }
 0x14a   :  { %v126_v23 = vpop.eup %125 }
 0x14b   :  { %90 = vadd.xlane.f32.xlu1 %v126_v23  ;;  %v128_v26 = vpop.eup %127 }
 0x14c   :  { %v58_v28 = vmul.f32 %v128_v26, %v54_v27  ;;  %v130_v29 = vpop.eup %129 }
 0x14d   :  { %v81_v33 = vmul.f32 %v130_v29, %v77_v31 }
 0x1d4   :  { %v68_v30 = vpop.xlane.xlu0 %67 }
 0x1d5   :  { %v69_v32 = vadd.f32 %v68_v30, %v58_v28 }
 0x1d7   :  { %71 = vst.msk [vmem:[#allocation3] sm:$0xff] %vm39_vm0, %v69_v32 }
 0x1d8   :  { %v91_v34 = vpop.xlane.xlu1 %90 }
 0x1d9   :  { %v92_v35 = vadd.f32 %v91_v34, %v81_v33 }
 0x1db   :  { %93 = vst.msk [vmem:[#allocation5] sm:$0xff] %vm39_vm0, %v92_v35 }
 0x1de   :  { %v98_v36 = vld [vmem:[#allocation3] sm:$0xff] }
 0x1df   :  { %131 = vlog2.f32 %v98_v36 }
 0x1e2   :  { %v103_v37 = vld [vmem:[#allocation5] sm:$0xff] }
 0x1e3   :  { %133 = vlog2.f32 %v103_v37 }
 0x1e9   :  { %v132_v38 = vpop.eup %131 }
 0x1ea   :  { %v100_v39 = vmul.f32 0.6931472, %v132_v38 }
 0x1ec   :  { %v102_v44 = vadd.f32 %v101_v42, %v100_v39 }
 0x1ed   :  { %v134_v40 = vpop.eup %133 }
 0x1ee   :  { %v105_v41 = vmul.f32 0.6931472, %v134_v40 }
 0x1f0   :  { %v107_v45 = vadd.f32 %v106_v43, %v105_v41 }
 0x1f2   :  { %v108_v46 = vadd.f32 %v107_v45, %v102_v44 }
 0x1f4   :  { %109 = vst.msk [vmem:[%s241_s2] sm:$0xff] %vm39_vm0, %v108_v46 }
 0x1f5   :  { %114 = vsyncpa [#allocation7], 1 }
 0x1f6   :  { %115 = vsyncpa [#allocation9], 1 }

</bundles_post_ra>
